<compile_context>
chip_gen: v6e
topology: v6e:2x2x1
jax: 0.10.0
libtpu: 0.0.40
codegen_flags: <defaults>
</compile_context>

<pallas_src>
import jax
import jax.numpy as jnp
from jax import lax
from jax.experimental import pallas as pl
from jax.experimental.pallas import tpu as pltpu


def mingru_tagger_kernel(ids_ref, emb_ref, w_h_ref, w_g_ref, tri_ref,
                         w_tag_ref, b_tag_ref, out_ref):
    T = ids_ref.shape[0]
    V = emb_ref.shape[0]

    # ---- Fused embedding gather: one-hot (T, V) @ emb_table (V, H) on the MXU.
    onehot = (lax.broadcasted_iota(jnp.int32, (T, V), 1)
              == ids_ref[...]).astype(jnp.float32)                    # (T, V)
    x = jnp.dot(onehot, emb_ref[...], preferred_element_type=jnp.float32)  # (T, H)

    # ---- to_hidden_and_gate (bias-free Linear(H, 2H), pre-split into two (H,H)).
    hidden = jnp.dot(x, w_h_ref[...], preferred_element_type=jnp.float32)  # (T, H)
    gate = jnp.dot(x, w_g_ref[...], preferred_element_type=jnp.float32)    # (T, H)

    # ---- minGRU log-space quantities. One shared exp(-|gate|) feeds both
    #      -softplus(gate) and -softplus(-gate).
    lp_gate = jnp.log(1.0 + jnp.exp(-jnp.abs(gate)))
    log_coeffs = -jnp.maximum(gate, 0.0) - lp_gate                     # -softplus(gate)
    log_z = jnp.minimum(gate, 0.0) - lp_gate                           # -softplus(-gate)
    log_tilde_h = jnp.where(                                           # log_g(hidden)
        hidden >= 0.0,
        jnp.log(jnp.maximum(hidden, 0.0) + 0.5),
        jnp.minimum(hidden, 0.0) - jnp.log(1.0 + jnp.exp(-jnp.abs(hidden))))
    log_values = log_z + log_tilde_h

    # ---- Heinsen associative scan, fully parallel on the MXU:
    #      a_star_t = cumsum_t(log_coeffs)          (lower-tri matmul)
    #      L_t      = logcumsumexp_t(values - a*)   (masked log-sum-exp, tri matmul)
    #      h_t      = exp(a_star_t + L_t)
    tri = tri_ref[...]                                                 # (T, T) lower-tri ones
    a_star = jnp.dot(tri, log_coeffs, preferred_element_type=jnp.float32)
    res = log_values - a_star
    m = jnp.max(res, axis=0, keepdims=True)                            # per-column max
    csum = jnp.dot(tri, jnp.exp(res - m), preferred_element_type=jnp.float32)
    h = jnp.exp(a_star + m + jnp.log(csum))                            # (T, H)

    # ---- hidden2tag (+bias) and log_softmax over the (lane-padded) tag dim.
    logits = jnp.dot(h, w_tag_ref[...],
                     preferred_element_type=jnp.float32) + b_tag_ref[...]  # (T, TG_PAD)
    mx = jnp.max(logits, axis=-1, keepdims=True)
    lse = mx + jnp.log(jnp.sum(jnp.exp(logits - mx), axis=-1, keepdims=True))
    out_ref[...] = logits - lse


def lstm_tagger_forward(sentence, params):
    """sentence: (T,) int token ids. Returns tag_scores of shape (1, T, tagset)."""
    emb_table = params["emb"].astype(jnp.float32)    # (V, H)
    w_hg = params["w_hg"].astype(jnp.float32)        # (H, 2H) == Linear(H,2H,bias=False).weight.T
    w_tag = params["w_tag"].astype(jnp.float32)      # (H, Tg) == hidden2tag.weight.T
    b_tag = params["b_tag"].astype(jnp.float32)      # (Tg,)

    T = sentence.shape[0]
    V, H = emb_table.shape
    Tg = w_tag.shape[1]
    TG_PAD = 128                                     # lane-dense output store

    # Pre-split the fused hidden/gate projection (avoids sub-128 lane slices in-kernel).
    w_h = w_hg[:, :H]
    w_g = w_hg[:, H:]

    # Lane-pad the tag projection; -1e30 bias on pad lanes keeps log_softmax exact.
    w_tag_pad = jnp.zeros((H, TG_PAD), jnp.float32).at[:, :Tg].set(w_tag)
    b_tag_pad = jnp.full((1, TG_PAD), -1e30, jnp.float32).at[0, :Tg].set(b_tag)

    # Lower-triangular ones mask, built once outside the kernel.
    tri = (lax.broadcasted_iota(jnp.int32, (T, T), 1)
           <= lax.broadcasted_iota(jnp.int32, (T, T), 0)).astype(jnp.float32)

    ids = sentence.astype(jnp.int32).reshape(T, 1)

    vspec = pl.BlockSpec(memory_space=pltpu.MemorySpace.VMEM)
    out_pad = pl.pallas_call(
        mingru_tagger_kernel,
        out_shape=jax.ShapeDtypeStruct((T, TG_PAD), jnp.float32),
        in_specs=[vspec] * 7,
        out_specs=vspec,
    )(ids, emb_table, w_h, w_g, tri, w_tag_pad, b_tag_pad)

    # TODO(synk): for throughput, add a batch-of-sentences grid axis
    # (dimension_semantics=("parallel",)) so the MXU/launch overhead amortizes;
    # the reference module's forward is single-sentence, so we keep one call.
    return out_pad[:, :Tg].reshape(1, T, Tg)


if __name__ == "__main__":
    hidden_dim = 32
    vocab_size = 50
    tagset_size = 8
    seq_len = 8

    key = jax.random.PRNGKey(0)
    k1, k2, k3, k4, k5 = jax.random.split(key, 5)

    params = {
        "emb": jax.random.normal(k1, (vocab_size, hidden_dim), jnp.float32),
        "w_hg": jax.random.normal(k2, (hidden_dim, 2 * hidden_dim), jnp.float32)
                * (1.0 / jnp.sqrt(hidden_dim)),
        "w_tag": jax.random.normal(k3, (hidden_dim, tagset_size), jnp.float32)
                 * (1.0 / jnp.sqrt(hidden_dim)),
        "b_tag": jax.random.normal(k4, (tagset_size,), jnp.float32) * 0.01,
    }
    sentence = jax.random.randint(k5, (seq_len,), 0, vocab_size, dtype=jnp.int32)

    tag_scores = lstm_tagger_forward(sentence, params)
    jax.block_until_ready(tag_scores)

    assert tag_scores.shape == (1, seq_len, tagset_size)
    # log_softmax sanity: probabilities along the tag axis must sum to ~1.
    probs_sum = jnp.sum(jnp.exp(tag_scores), axis=-1)
    assert bool(jnp.all(jnp.isfinite(tag_scores)))
    assert bool(jnp.allclose(probs_sum, 1.0, atol=1e-4))
    print("KERNEL_OK")
</pallas_src>

<mosaic_0001>
module attributes {stable_mosaic.version = 11 : i64} {
  func.func @mingru_tagger_kernel(%arg0: memref<8x1xi32, #tpu.memory_space<vmem>>, %arg1: memref<50x32xf32, #tpu.memory_space<vmem>>, %arg2: memref<32x32xf32, #tpu.memory_space<vmem>>, %arg3: memref<32x32xf32, #tpu.memory_space<vmem>>, %arg4: memref<8x8xf32, #tpu.memory_space<vmem>>, %arg5: memref<32x128xf32, #tpu.memory_space<vmem>>, %arg6: memref<1x128xf32, #tpu.memory_space<vmem>>, %arg7: memref<8x128xf32, #tpu.memory_space<vmem>>) attributes {dimension_semantics = [], scalar_prefetch = 0 : i64, scratch_operands = 0 : i64, tpu.core_type = #tpu.core_type<tc>} {
    %0 = tpu.iota {dimensions = array<i32: 1>} : vector<8x50xi32>
    %c0 = arith.constant 0 : index
    %c0_0 = arith.constant 0 : index
    %1 = vector.load %arg0[%c0, %c0_0] : memref<8x1xi32, #tpu.memory_space<vmem>>, vector<8x1xi32>
    %2 = vector.broadcast %1 : vector<8x1xi32> to vector<8x50xi32>
    %3 = arith.cmpi eq, %0, %2 : vector<8x50xi32>
    %4 = arith.extui %3 : vector<8x50xi1> to vector<8x50xi32>
    %5 = arith.sitofp %4 : vector<8x50xi32> to vector<8x50xf32>
    %c0_1 = arith.constant 0 : index
    %c0_2 = arith.constant 0 : index
    %6 = vector.load %arg1[%c0_1, %c0_2] : memref<50x32xf32, #tpu.memory_space<vmem>>, vector<50x32xf32>
    %cst = arith.constant dense<0.000000e+00> : vector<8x32xf32>
    %7 = tpu.matmul %5, %6, %cst {dimension_numbers = #tpu.dot_dimension_numbers<[1], [0], [0], [1], [0, 0, 1, 1], [], []>} : vector<8x50xf32>, vector<50x32xf32>, vector<8x32xf32> -> vector<8x32xf32>
    %c0_3 = arith.constant 0 : index
    %c0_4 = arith.constant 0 : index
    %8 = vector.load %arg2[%c0_3, %c0_4] : memref<32x32xf32, #tpu.memory_space<vmem>>, vector<32x32xf32>
    %cst_5 = arith.constant dense<0.000000e+00> : vector<8x32xf32>
    %9 = tpu.matmul %7, %8, %cst_5 {dimension_numbers = #tpu.dot_dimension_numbers<[1], [0], [0], [1], [0, 0, 1, 1], [], []>} : vector<8x32xf32>, vector<32x32xf32>, vector<8x32xf32> -> vector<8x32xf32>
    %c0_6 = arith.constant 0 : index
    %c0_7 = arith.constant 0 : index
    %10 = vector.load %arg3[%c0_6, %c0_7] : memref<32x32xf32, #tpu.memory_space<vmem>>, vector<32x32xf32>
    %cst_8 = arith.constant dense<0.000000e+00> : vector<8x32xf32>
    %11 = tpu.matmul %7, %10, %cst_8 {dimension_numbers = #tpu.dot_dimension_numbers<[1], [0], [0], [1], [0, 0, 1, 1], [], []>} : vector<8x32xf32>, vector<32x32xf32>, vector<8x32xf32> -> vector<8x32xf32>
    %12 = math.absf %11 : vector<8x32xf32>
    %cst_9 = arith.constant 0.000000e+00 : f32
    %13 = vector.broadcast %cst_9 : f32 to vector<8x32xf32>
    %14 = arith.subf %13, %12 : vector<8x32xf32>
    %15 = math.exp %14 : vector<8x32xf32>
    %cst_10 = arith.constant 1.000000e+00 : f32
    %16 = vector.broadcast %cst_10 : f32 to vector<8x32xf32>
    %17 = arith.addf %16, %15 : vector<8x32xf32>
    %18 = math.log %17 : vector<8x32xf32>
    %cst_11 = arith.constant 0.000000e+00 : f32
    %19 = vector.broadcast %cst_11 : f32 to vector<8x32xf32>
    %20 = arith.maximumf %11, %19 : vector<8x32xf32>
    %cst_12 = arith.constant 0.000000e+00 : f32
    %21 = vector.broadcast %cst_12 : f32 to vector<8x32xf32>
    %22 = arith.subf %21, %20 : vector<8x32xf32>
    %23 = arith.subf %22, %18 : vector<8x32xf32>
    %cst_13 = arith.constant 0.000000e+00 : f32
    %24 = vector.broadcast %cst_13 : f32 to vector<8x32xf32>
    %25 = arith.minimumf %11, %24 : vector<8x32xf32>
    %26 = arith.subf %25, %18 : vector<8x32xf32>
    %cst_14 = arith.constant 0.000000e+00 : f32
    %27 = vector.broadcast %cst_14 : f32 to vector<8x32xf32>
    %28 = arith.cmpf oge, %9, %27 : vector<8x32xf32>
    %cst_15 = arith.constant 0.000000e+00 : f32
    %29 = vector.broadcast %cst_15 : f32 to vector<8x32xf32>
    %30 = arith.maximumf %9, %29 : vector<8x32xf32>
    %cst_16 = arith.constant 5.000000e-01 : f32
    %31 = vector.broadcast %cst_16 : f32 to vector<8x32xf32>
    %32 = arith.addf %30, %31 : vector<8x32xf32>
    %33 = math.log %32 : vector<8x32xf32>
    %cst_17 = arith.constant 0.000000e+00 : f32
    %34 = vector.broadcast %cst_17 : f32 to vector<8x32xf32>
    %35 = arith.minimumf %9, %34 : vector<8x32xf32>
    %36 = math.absf %9 : vector<8x32xf32>
    %cst_18 = arith.constant 0.000000e+00 : f32
    %37 = vector.broadcast %cst_18 : f32 to vector<8x32xf32>
    %38 = arith.subf %37, %36 : vector<8x32xf32>
    %39 = math.exp %38 : vector<8x32xf32>
    %cst_19 = arith.constant 1.000000e+00 : f32
    %40 = vector.broadcast %cst_19 : f32 to vector<8x32xf32>
    %41 = arith.addf %40, %39 : vector<8x32xf32>
    %42 = math.log %41 : vector<8x32xf32>
    %43 = arith.subf %35, %42 : vector<8x32xf32>
    %44 = arith.select %28, %33, %43 : vector<8x32xi1>, vector<8x32xf32>
    %45 = arith.addf %26, %44 : vector<8x32xf32>
    %c0_20 = arith.constant 0 : index
    %c0_21 = arith.constant 0 : index
    %46 = vector.load %arg4[%c0_20, %c0_21] : memref<8x8xf32, #tpu.memory_space<vmem>>, vector<8x8xf32>
    %cst_22 = arith.constant dense<0.000000e+00> : vector<8x32xf32>
    %47 = tpu.matmul %46, %23, %cst_22 {dimension_numbers = #tpu.dot_dimension_numbers<[1], [0], [0], [1], [0, 0, 1, 1], [], []>} : vector<8x8xf32>, vector<8x32xf32>, vector<8x32xf32> -> vector<8x32xf32>
    %48 = arith.subf %45, %47 : vector<8x32xf32>
    %cst_23 = arith.constant dense<0xFF800000> : vector<32xf32>
    %49 = vector.multi_reduction <maximumf>, %48, %cst_23 [0] : vector<8x32xf32> to vector<32xf32>
    %50 = vector.shape_cast %49 : vector<32xf32> to vector<1x32xf32>
    %51 = vector.broadcast %50 : vector<1x32xf32> to vector<8x32xf32>
    %52 = arith.subf %48, %51 : vector<8x32xf32>
    %53 = math.exp %52 : vector<8x32xf32>
    %cst_24 = arith.constant dense<0.000000e+00> : vector<8x32xf32>
    %54 = tpu.matmul %46, %53, %cst_24 {dimension_numbers = #tpu.dot_dimension_numbers<[1], [0], [0], [1], [0, 0, 1, 1], [], []>} : vector<8x8xf32>, vector<8x32xf32>, vector<8x32xf32> -> vector<8x32xf32>
    %55 = vector.broadcast %50 : vector<1x32xf32> to vector<8x32xf32>
    %56 = arith.addf %47, %55 : vector<8x32xf32>
    %57 = math.log %54 : vector<8x32xf32>
    %58 = arith.addf %56, %57 : vector<8x32xf32>
    %59 = math.exp %58 : vector<8x32xf32>
    %c0_25 = arith.constant 0 : index
    %c0_26 = arith.constant 0 : index
    %60 = vector.load %arg5[%c0_25, %c0_26] : memref<32x128xf32, #tpu.memory_space<vmem>>, vector<32x128xf32>
    %cst_27 = arith.constant dense<0.000000e+00> : vector<8x128xf32>
    %61 = tpu.matmul %59, %60, %cst_27 {dimension_numbers = #tpu.dot_dimension_numbers<[1], [0], [0], [1], [0, 0, 1, 1], [], []>} : vector<8x32xf32>, vector<32x128xf32>, vector<8x128xf32> -> vector<8x128xf32>
    %c0_28 = arith.constant 0 : index
    %c0_29 = arith.constant 0 : index
    %62 = vector.load %arg6[%c0_28, %c0_29] : memref<1x128xf32, #tpu.memory_space<vmem>>, vector<1x128xf32>
    %63 = vector.broadcast %62 : vector<1x128xf32> to vector<8x128xf32>
    %64 = arith.addf %61, %63 : vector<8x128xf32>
    %cst_30 = arith.constant dense<0xFF800000> : vector<8xf32>
    %65 = vector.multi_reduction <maximumf>, %64, %cst_30 [1] : vector<8x128xf32> to vector<8xf32>
    %66 = vector.shape_cast %65 : vector<8xf32> to vector<8x1xf32>
    %67 = vector.broadcast %66 : vector<8x1xf32> to vector<8x128xf32>
    %68 = arith.subf %64, %67 : vector<8x128xf32>
    %69 = math.exp %68 : vector<8x128xf32>
    %cst_31 = arith.constant dense<0.000000e+00> : vector<8xf32>
    %70 = vector.multi_reduction <add>, %69, %cst_31 [1] : vector<8x128xf32> to vector<8xf32>
    %71 = vector.shape_cast %70 : vector<8xf32> to vector<8x1xf32>
    %72 = math.log %71 : vector<8x1xf32>
    %73 = arith.addf %66, %72 : vector<8x1xf32>
    %74 = vector.broadcast %73 : vector<8x1xf32> to vector<8x128xf32>
    %75 = arith.subf %64, %74 : vector<8x128xf32>
    %c0_32 = arith.constant 0 : index
    %c0_33 = arith.constant 0 : index
    %76 = vector.load %arg7[%c0_32, %c0_33] : memref<8x128xf32, #tpu.memory_space<vmem>>, vector<8x128xf32>
    tpu.vector_store %arg7[%c0_32, %c0_33], %75 {strides = array<i32>} : memref<8x128xf32, #tpu.memory_space<vmem>>, vector<8x128xf32>,
    return
  }
}

</mosaic_0001>

<bundles_post_ra>
// kernel: tpu_custom_call.1
= control target key start
LH: loop header
LB: loop body
LE: loop exit
PB: predicated region body
PF: predicated region fallthrough
CT: control target
= control target key end

     0   :  { %vm47_vm0 = vcmask 1041408   ;;  %v716_v2 = vmov 0   ;;  %v717_v3 = vmov 0.0   ;;  %vm718_vm1 = vmmov 0   ;;  %s869_s0 = inlined_call_operand.vmem [shape: s32[8,1], index: 0, kind: input, shape index: {}]   ;;  %s870_s1 = inlined_call_operand.vmem [shape: f32[50,32], index: 1, kind: input, shape index: {}]   ;;  %s871_s2 = inlined_call_operand.vmem [shape: f32[32,32], index: 2, kind: input, shape index: {}]   ;;  %s872_s3 = inlined_call_operand.vmem [shape: f32[32,32], index: 3, kind: input, shape index: {}]   ;;  %s873_s4 = inlined_call_operand.vmem [shape: f32[8,8], index: 4, kind: input, shape index: {}]   ;;  %s874_s5 = inlined_call_operand.vmem [shape: f32[32,128], index: 5, kind: input, shape index: {}]   ;;  %s875_s6 = inlined_call_operand.vmem [shape: f32[1,128], index: 6, kind: input, shape index: {}]   ;;  %s876_s7 = inlined_call_operand.hbm [shape: f32[8,128], index: 7, kind: output, shape index: {}]  }
   0x1   :  { %v29_v0 = vld [vmem:[%s869_s0] sm:$0xff]  ;;  %v42_v1 = vld [vmem:[%s870_s1 + $0x30] sm:$0x3]  ;;  %673 = vset.pattern.permute.xlu0 %v716_v2  ;;  %609 = vmatprep.subr.mxu0 %v717_v3  ;;  %v41_v4 = vld [vmem:[%s870_s1 + $0x28] sm:$0xff] }
   0x2   :  { %31 = vperm.xlu0 %673, %v29_v0   ;;  %610 = vmatpush3.msk.msra.mxu0 %vm47_vm0, %v42_v1  ;;  %v40_v5 = vld [vmem:[%s870_s1 + $0x20] sm:$0xff]  ;;  %v124_v6 = vld [vmem:[%s871_s2 + $0x18] sm:$0xff]  ;;  %v123_v7 = vld [vmem:[%s871_s2 + $0x10] sm:$0xff] }
   0x3   :  { %611 = vmatprep.subr.mxu0 %v717_v3  ;;  %623 = vmatprep.mubr.msk.f32.mxu0 %vm718_vm1, %v717_v3 }
   0x4   :  { %612 = vmatpush3.msra.mxu0 %v41_v4  ;;  %626 = vmatprep.subr.mxu1 %v717_v3 }
   0x5   :  { %12 = vsyncpa [#allocation3], 0  ;;  %613 = vmatprep.subr.mxu0 %v717_v3  ;;  %v39_v8 = vld [vmem:[%s870_s1 + $0x18] sm:$0xff]  ;;  %627 = vmatpush3.msra.mxu1 %v124_v6  ;;  %v122_v9 = vld [vmem:[%s871_s2 + $0x8] sm:$0xff]  ;;  %v27_v14 = vlaneseq  ;;  %vm43_vm2 = vcmask 408576   ;;  %vm125_vm4 = vcmask 261120  }
   0x6   :  { %614 = vmatpush3.msra.mxu0 %v40_v5  ;;  %628 = vmatprep.subr.mxu1 %v717_v3  ;;  %v38_v10 = vld [vmem:[%s870_s1 + $0x10] sm:$0xff]  ;;  %v121_v11 = vld [vmem:[%s871_s2] sm:$0xff]  ;;  %v37_v12 = vld [vmem:[%s870_s1 + $0x8] sm:$0xff]  ;;  %vm302_vm6 = vcmask 64512  }
   0x7   :  { %615 = vmatprep.subr.mxu0 %v717_v3  ;;  %629 = vmatpush3.msra.mxu1 %v123_v7  ;;  %v36_v13 = vld [vmem:[%s870_s1] sm:$0xff]  ;;  %v28_v15 = vand.u32 127, %v27_v14  ;;  %v202_v18 = vld [vmem:[%s872_s3 + $0x18] sm:$0xff]  ;;  %v201_v20 = vld [vmem:[%s872_s3 + $0x10] sm:$0xff] }
   0x8   :  { %616 = vmatpush3.msra.mxu0 %v39_v8  ;;  %630 = vmatprep.subr.mxu1 %v717_v3  ;;  %v200_v22 = vld [vmem:[%s872_s3 + $0x8] sm:$0xff]  ;;  %v199_v23 = vld [vmem:[%s872_s3] sm:$0xff]  ;;  %v466_v7 = vld [vmem:[%s874_s5 + $0x18] sm:$0xff] }
   0x9   :  { %617 = vmatprep.subr.mxu0 %v717_v3  ;;  %631 = vmatpush3.msra.mxu1 %v122_v9  ;;  %v301_v53 = vld [vmem:[%s873_s4] sm:$0xff]  ;;  %v465_v8 = vld [vmem:[%s874_s5 + $0x10] sm:$0xff]  ;;  %v464_v9 = vld [vmem:[%s874_s5 + $0x8] sm:$0xff] }
   0xa   :  { %618 = vmatpush3.msra.mxu0 %v38_v10  ;;  %632 = vmatprep.subr.mxu1 %v717_v3  ;;  %v463_v10 = vld [vmem:[%s874_s5] sm:$0xff]  ;;  %s719_s5 = smov [#allocation2]  }
   0xb   :  { %619 = vmatprep.subr.mxu0 %v717_v3  ;;  %633 = vmatpush3.msra.mxu1 %v121_v11  ;;  %s565_s16 = sshll.u32 %s719_s5, 4  ;;  %s566_s16 = int_to_ptr.vmem [resolvable:$true] %s565_s16 }
   0xc   :  { %620 = vmatpush3.msra.mxu0 %v37_v12  ;;  %634 = vmatprep.mubr.msk.f32.mxu1 %vm718_vm1, %v717_v3  ;;  %p699_p1 = scmp.lt.s32.totalorder %s566_s16, %s566_s16 }
   0xd   :  { %621 = vmatprep.subr.mxu0 %v717_v3  ;;  %637 = vmatprep.subr.mxu1 %v717_v3 }
   0xe   :  { %622 = vmatpush3.msra.mxu0 %v36_v13 }
   0xf   :  { %658 = vmatprep.subr.mxu0 %v717_v3 }
  0x7d   :  { %v32_v16 = vpop.permute.xlu0 %31 }
  0x7e   :  { %vm33_vm3 = vcmp.eq.s32.totalorder %v28_v15, %v32_v16 }
  0x7f   :  { %v573_v17 = vsel %vm33_vm3, 1.0, %v717_v3 }
  0x80   :  { %624 = vmatmul.mubr.msk.f32.vlgmr.msra.gmra.mxu0 %vm43_vm2, %v573_v17 }
  0x81   :  { %666 = vmatprep.mubr.msk.f32.mxu0 %vm718_vm1, %v717_v3  ;;  %659 = vmatpush3.msra.mxu0 %v466_v7 }
  0x82   :  { %660 = vmatprep.subr.mxu0 %v717_v3 }
  0x83   :  { %661 = vmatpush3.msra.mxu0 %v465_v8 }
  0x84   :  { %662 = vmatprep.subr.mxu0 %v717_v3 }
  0x85   :  { %663 = vmatpush3.msra.mxu0 %v464_v9 }
  0x86   :  { %664 = vmatprep.subr.mxu0 %v717_v3 }
  0x87   :  { %665 = vmatpush3.msra.mxu0 %v463_v10 }
 0x140   :  { %v117_v19 = vpop.f32.mrf.mxu0 }
 0x141   :  { %635 = vmatmul.mubr.msk.f32.vlgmr.msra.gmra.mxu1 %vm125_vm4, %v117_v19 }
 0x142   :  { %638 = vmatpush3.msra.mxu1 %v202_v18  ;;  %v625_v21 = vpop.f32.mrf.mxu0  ;;  %645 = vmatprep.mubr.msk.f32.mxu1 %vm718_vm1, %v717_v3  ;;  %v580_v18 = vld [vmem:[%s875_s6] ss:$0 sm:$0xff]  ;;  %s694_s6 = scalar_lea.vmem %s566_s16, 128 }
 0x143   :  { %639 = vmatprep.subr.mxu1 %v717_v3  ;;  %p695_p0 = scmp.ne.s32.totalorder %s566_s16, %s694_s6  ;;  %p700_p2 = scmp.lt.s32.totalorder %s694_s6, %s694_s6 }
 0x144   :  { %640 = vmatpush3.msra.mxu1 %v201_v20 }
 0x145   :  { %641 = vmatprep.subr.mxu1 %v717_v3  ;;  %p701_p3 = por %p700_p2, %p699_p1 }
 0x146   :  { %642 = vmatpush3.msra.mxu1 %v200_v22 }
 0x147   :  { %643 = vmatprep.subr.mxu1 %v717_v3  ;;  %p702_p4 = pnand %p701_p3, %p695_p0 }
 0x148   :  { %644 = vmatpush3.msra.mxu1 %v199_v23 }
 0x149   :  { %646 = vmatmul.mubr.msk.f32.vlgmr.msra.gmra.mxu1 %vm125_vm4, %v117_v19  ;;  %648 = vmatprep.subr.mxu1 %v717_v3 }
 0x14a   :  { %650 = vmatprep.mubr.msk.f32.mxu1 %vm718_vm1, %v717_v3 }
 0x201   :  { %v195_v24 = vpop.f32.mrf.mxu1 }
 0x202   :  { %v291_v25 = vand.u32 2147483647, %v195_v24  ;;  %v286_v36 = vmax.f32 %v195_v24, 0.0  ;;  %v290_v43 = vmin.f32 %v195_v24, 0.0  ;;  %vm285_vm5 = vcmp.ge.f32.partialorder %v195_v24, 0.0 }
 0x203   :  { %v636_v26 = vpop.f32.mrf.mxu1 }
 0x204   :  { %v292_v27 = vsub.f32 0.0, %v291_v25  ;;  %v287_v37 = vadd.f32 0.5, %v286_v36 }
 0x206   :  { %v293_v28 = vmul.f32 1.442695, %v292_v27 }
 0x208   :  { %674 = vpow2.f32 %v293_v28 }
 0x209   :  { %v269_v29 = vpop.f32.mrf.mxu1 }
 0x20a   :  { %v273_v30 = vand.u32 2147483647, %v269_v29  ;;  %v280_v42 = vmax.f32 %v269_v29, 0.0  ;;  %v283_v49 = vmin.f32 %v269_v29, 0.0 }
 0x20b   :  { %v647_v31 = vpop.f32.mrf.mxu1 }
 0x20c   :  { %v274_v32 = vsub.f32 0.0, %v273_v30  ;;  %v281_v48 = vsub.f32 0.0, %v280_v42 }
 0x20e   :  { %v275_v33 = vmul.f32 1.442695, %v274_v32 }
 0x210   :  { %676 = vpow2.f32 %v275_v33 }
 0x215   :  { %v675_v34 = vpop.eup %674 }
 0x216   :  { %v295_v35 = vadd.f32 1.0, %v675_v34 }
 0x218   :  { %678 = vlog2.f32 %v295_v35 }
 0x219   :  { %680 = vlog2.f32 %v287_v37 }
 0x21d   :  { %v677_v38 = vpop.eup %676 }
 0x21e   :  { %v277_v39 = vadd.f32 1.0, %v677_v38 }
 0x220   :  { %682 = vlog2.f32 %v277_v39 }
 0x225   :  { %v679_v40 = vpop.eup %678 }
 0x226   :  { %v297_v41 = vmul.f32 0.6931472, %v679_v40  ;;  %v681_v44 = vpop.eup %680 }
 0x227   :  { %v289_v50 = vmul.f32 0.6931472, %v681_v44 }
 0x228   :  { %v298_v46 = vsub.f32 %v290_v43, %v297_v41 }
 0x22a   :  { %v299_v54 = vsel %vm285_vm5, %v289_v50, %v298_v46 }
 0x22d   :  { %v683_v45 = vpop.eup %682 }
 0x22e   :  { %v279_v47 = vmul.f32 0.6931472, %v683_v45 }
 0x230   :  { %v282_v51 = vsub.f32 %v281_v48, %v279_v47  ;;  %v284_v52 = vsub.f32 %v283_v49, %v279_v47 }
 0x232   :  { %649 = vmatpush3.msra.mxu1 %v282_v51  ;;  %v300_v55 = vadd.f32 %v299_v54, %v284_v52 }
 0x233   :  { %651 = vmatmul.mubr.msk.f32.vlgmr.msra.gmra.mxu1 %vm302_vm6, %v301_v53  ;;  %653 = vmatprep.subr.mxu1 %v717_v3 }
 0x234   :  { %655 = vmatprep.mubr.msk.f32.mxu1 %vm718_vm1, %v717_v3 }
 0x2f3   :  { %v372_v56 = vpop.f32.mrf.mxu1 }
 0x2f4   :  { %v376_v57 = vsub.f32 %v300_v55, %v372_v56 }
 0x2f5   :  { %v652_v58 = vpop.f32.mrf.mxu1 }
 0x2f6   :  { %v377_v59 = vsel %vm125_vm4, %v376_v57, -inf }
 0x2f7   :  { %v378_v60 = vrot.slane %v377_v59, 4 }
 0x2f9   :  { %v379_v61 = vmax.f32 %v377_v59, %v378_v60 }
 0x2fb   :  { %v380_v62 = vrot.slane %v379_v61, 2 }
 0x2fd   :  { %v381_v63 = vmax.f32 %v379_v61, %v380_v62 }
 0x2ff   :  { %v382_v0 = vrot.slane %v381_v63, 1 }
 0x301   :  { %v383_v1 = vmax.f32 %v381_v63, %v382_v0 }
 0x303   :  { %v384_v2 = vsub.f32 %v376_v57, %v383_v1  ;;  %v457_v4 = vadd.f32 %v383_v1, %v372_v56 }
 0x305   :  { %v385_v5 = vmul.f32 1.442695, %v384_v2 }
 0x307   :  { %684 = vpow2.f32 %v385_v5 }
 0x314   :  { %v685_v6 = vpop.eup %684 }
 0x315   :  { %654 = vmatpush3.msra.mxu1 %v685_v6 }
 0x316   :  { %656 = vmatmul.mubr.msk.f32.vlgmr.msra.gmra.mxu1 %vm302_vm6, %v301_v53 }
 0x3d6   :  { %v453_v11 = vpop.f32.mrf.mxu1 }
 0x3d7   :  { %686 = vlog2.f32 %v453_v11 }
 0x3d8   :  { %v657_v12 = vpop.f32.mrf.mxu1 }
 0x3e4   :  { %v687_v13 = vpop.eup %686 }
 0x3e5   :  { %v459_v14 = vmul.f32 0.6931472, %v687_v13 }
 0x3e7   :  { %v460_v15 = vadd.f32 %v459_v14, %v457_v4 }
 0x3e9   :  { %v461_v16 = vmul.f32 1.442695, %v460_v15 }
 0x3eb   :  { %688 = vpow2.f32 %v461_v16 }
 0x3f8   :  { %v689_v17 = vpop.eup %688 }
 0x3f9   :  { %667 = vmatmul.mubr.msk.f32.vlgmr.msra.gmra.mxu0 %vm125_vm4, %v689_v17 }
 0x4b9   :  { %v543_v19 = vpop.f32.mrf.mxu0 }
 0x4ba   :  { %v544_v20 = vadd.f32 %v580_v18, %v543_v19 }
 0x4bb   :  { %v668_v21 = vpop.f32.mrf.mxu0 }
 0x4bc   :  { %547 = vmax.xlane.f32.xlu0 %v544_v20 }
 0x545   :  { %v548_v3 = vpop.xlane.xlu0 %547 }
 0x546   :  { %v549_v22 = vsub.f32 %v544_v20, %v548_v3 }
 0x548   :  { %v550_v23 = vmul.f32 1.442695, %v549_v22 }
 0x54a   :  { %690 = vpow2.f32 %v550_v23 }
 0x557   :  { %v691_v24 = vpop.eup %690 }
 0x558   :  { %552 = vadd.xlane.f32.xlu1 %v691_v24 }
 0x5e1   :  { %v553_v25 = vpop.xlane.xlu1 %552 }
 0x5e2   :  { %692 = vlog2.f32 %v553_v25 }
 0x5ef   :  { %v693_v26 = vpop.eup %692 }
 0x5f0   :  { %v555_v27 = vmul.f32 0.6931472, %v693_v26 }
 0x5f2   :  { %v556_v28 = vadd.f32 %v555_v27, %v548_v3 }
 0x5f4   :  { %v557_v29 = vsub.f32 %v544_v20, %v556_v28 }
 0x5f6   :  { %558 = vst [vmem:[#allocation2] sm:$0xff] %v557_v29 }
 0x5f7   :  { %705 = shalt.err (!%p702_p4)
}
 0x5f8   :  { %568 = dma.vmem_to_hbm [thread:$0]  %s566_s16, 128, %s876_s7, [#allocation3]  }
 0x5f9   :  { %714 = dma.done.wait [#allocation3], 128  }
 0x5fa   :  { %715 = vsyncadd [#allocation3], 4294967168 }
 0x5fb   :  { %572 = vsyncpa [#allocation3], 1 }

</bundles_post_ra>
